<compile_context>
chip_gen: v6e
topology: v6e:2x2x1
jax: 0.10.0
libtpu: 0.0.40
codegen_flags: <defaults>
</compile_context>

<pallas_src>
import jax
import jax.numpy as jnp
from jax import lax
from jax.experimental import pallas as pl
from jax.experimental.pallas import tpu as pltpu


def _make_kernel(U, D, UD, sub, num_sub):
    """Builds the kernel mapping one (D, nt) feats slab -> one (U*D, nt) output slab."""

    def kernel(x_ref, w1_ref, b1_ref, w2_ref, b2_ref, o_ref):
        # Weights/biases are VMEM-resident (constant index_map); load them once.
        w1 = w1_ref[...]          # (U*H, D)
        b1 = b1_ref[...]          # (U*H, 1) f32
        w2 = w2_ref[...]          # (U*D, U*H)
        b2 = b2_ref[...]          # (U*D, 1) f32

        def compute_chunk(start):
            x = x_ref[:, pl.ds(start, sub)]                          # (D, sub)
            h = jnp.dot(w1, x, preferred_element_type=jnp.float32) + b1
            h = jnp.maximum(h, 0.0)                                  # ReLU
            y = jnp.dot(w2, h.astype(w2.dtype),
                        preferred_element_type=jnp.float32) + b2     # (U*D, sub) f32
            # residual: repeat(feats, 'b c n -> b c n u') == broadcast x over the
            # U group slabs (no materialized concat/tile).
            y = (y.reshape(U, D, sub) + x.astype(jnp.float32)).reshape(UD, sub)
            o_ref[:, pl.ds(start, sub)] = y.astype(o_ref.dtype)

        if num_sub == 1:
            compute_chunk(0)
        else:
            def body(c, carry):
                compute_chunk(pl.multiple_of(c * sub, sub))
                return carry
            lax.fori_loop(0, num_sub, body, 0, unroll=True)

    return kernel


def feats_upsample_layer(feats, w1, b1, w2, b2, upsample_rate, *,
                         n_tile=None, sub_tile=1024,
                         matmul_dtype=None, out_dtype=None,
                         output_layout="bcnu"):
    """feats: (B, D, N); w1: (H, D//U, 1, 1); b1: (H,); w2: (D, H, 1, 1); b2: (D,)."""
    B, D, N = feats.shape
    U = int(upsample_rate)
    assert D % U == 0, "upsample_rate must divide dim"
    Cin = D // U
    H = w1.shape[0]
    UH, UD = U * H, U * D

    compute_dtype = feats.dtype if matmul_dtype is None else jnp.dtype(matmul_dtype)
    out_dtype = feats.dtype if out_dtype is None else jnp.dtype(out_dtype)

    # ---- fold the grouped 1x1 convs into full-channel matmuls (tiny, done once) ----
    #   W1_full[g*H + o, c*U + g'] = W1[o, c] * delta(g, g')      (U*H, D)
    #   W2_bd  [g*D + d, g'*H + o] = W2[d, o] * delta(g, g')      (U*D, U*H)
    w1_2d = w1.reshape(H, Cin).astype(jnp.float32)
    w2_2d = w2.reshape(D, H).astype(jnp.float32)
    eye_u = jnp.eye(U, dtype=jnp.float32)
    w1_full = jnp.einsum('oc,gk->gock', w1_2d, eye_u).reshape(UH, D)
    w2_bd = jnp.kron(eye_u, w2_2d)
    b1_t = jnp.tile(b1.astype(jnp.float32), U).reshape(UH, 1)
    b2_t = jnp.tile(b2.astype(jnp.float32), U).reshape(UD, 1)

    feats_k = feats.astype(compute_dtype)
    w1_full = w1_full.astype(compute_dtype)
    w2_bd = w2_bd.astype(compute_dtype)

    # ---- tiling over N (lane axis) ----
    if n_tile is None:
        n_tile = 16384                       # big DMA tile; sub-chunks bound VMEM
    nt = max(1, min(int(n_tile), N))
    if nt < N:
        nt = 128 * pl.cdiv(nt, 128)          # lane-aligned block width
    sub = max(1, min(int(sub_tile), nt))     # inner compute chunk (lanes)
    if sub < nt:
        sub = max(128, 128 * (sub // 128))
        nt = sub * pl.cdiv(nt, sub)          # block = whole number of sub-chunks
    # Leave >=4 grid steps when possible (v7x: 2 TCs over "parallel" axes + pipelining).
    while B * pl.cdiv(N, nt) < 4 and nt // sub >= 2:
        nt = sub * ((nt // sub + 1) // 2)
    num_sub = nt // sub
    grid = (B, pl.cdiv(N, nt))

    # Raise the scoped-VMEM limit only when an oversized user tile needs it
    # (the defaults above stay under the 16 MiB v5e scoped default).
    est_vmem = (2 * D * nt * compute_dtype.itemsize          # double-buffered input slab
                + 2 * UD * nt * out_dtype.itemsize           # double-buffered output slab
                + 2 * (UH + UD) * sub * 4                    # matmul intermediates (f32)
                + 2 * (UH * D + UD * UH + UH + UD) * 4       # resident weights/biases
                + (1 << 20))
    vmem_limit = None
    if est_vmem > (12 << 20):
        vmem_limit = int(min(max(est_vmem, 32 << 20), 64 << 20))

    kernel = _make_kernel(U, D, UD, sub, num_sub)

    out_lane = pl.pallas_call(
        kernel,
        out_shape=jax.ShapeDtypeStruct((B, UD, N), out_dtype),
        grid_spec=pltpu.PrefetchScalarGridSpec(
            num_scalar_prefetch=0,
            grid=grid,
            in_specs=[
                pl.BlockSpec((None, D, nt), lambda b, n: (b, 0, n)),   # feats slab
                pl.BlockSpec((UH, D), lambda b, n: (0, 0)),            # W1_full (resident)
                pl.BlockSpec((UH, 1), lambda b, n: (0, 0)),            # b1 (resident)
                pl.BlockSpec((UD, UH), lambda b, n: (0, 0)),           # W2_bd (resident)
                pl.BlockSpec((UD, 1), lambda b, n: (0, 0)),            # b2 (resident)
            ],
            out_specs=pl.BlockSpec((None, UD, nt), lambda b, n: (b, 0, n)),
        ),
        compiler_params=pltpu.CompilerParams(
            dimension_semantics=("parallel", "parallel"),
            vmem_limit_bytes=vmem_limit),
    )(feats_k, w1_full, b1_t, w2_bd, b2_t)

    if output_layout == "bucn":
        # Transpose-free view: out[b, u, c, n] (kernel rows are ordered u*D + c).
        return out_lane.reshape(B, U, D, N)
    # PyTorch layout 'b c n u' -- single layout fix-up pass.
    return jnp.transpose(out_lane.reshape(B, U, D, N), (0, 2, 3, 1))


def _reference(feats, w1, b1, w2, b2, U):
    """Pure-JAX reference mirroring the PyTorch forward."""
    B, D, N = feats.shape
    Cin = D // U
    H = w1.shape[0]
    xg = feats.reshape(B, Cin, U, N)                      # 'b (c g) n -> b c g n'
    xg = jnp.transpose(xg, (0, 1, 3, 2))                  # (B, Cin, N, U)  NCHW
    h = jnp.einsum('oc,bcnu->bonu', w1.reshape(H, Cin), xg) + b1[None, :, None, None]
    h = jnp.maximum(h, 0.0)
    y = jnp.einsum('oh,bhnu->bonu', w2.reshape(D, H), h) + b2[None, :, None, None]
    return y + feats[:, :, :, None]                       # + repeat 'b c n -> b c n u'


if __name__ == "__main__":
    # args.dim = 8, args.hidden_dim = 32, upsample_rate = 4, batch = 2, N = 512
    B, D, N, U, H = 2, 8, 512, 4, 32
    Cin = D // U

    key = jax.random.PRNGKey(0)
    k1, k2, k3, k4, k5 = jax.random.split(key, 5)
    feats = jax.random.normal(k1, (B, D, N), jnp.float32)
    # PyTorch Conv2d 1x1 weight shapes
    w1 = jax.random.normal(k2, (H, Cin, 1, 1), jnp.float32) * 0.1
    b1 = jax.random.normal(k3, (H,), jnp.float32) * 0.1
    w2 = jax.random.normal(k4, (D, H, 1, 1), jnp.float32) * 0.1
    b2 = jax.random.normal(k5, (D,), jnp.float32) * 0.1

    ref = _reference(feats, w1, b1, w2, b2, U)

    # --- default f32 path (big-tile defaults; N=512 -> single 512-lane block/batch) ---
    out = feats_upsample_layer(feats, w1, b1, w2, b2, U)
    out = jax.block_until_ready(out)
    assert out.shape == (B, D, N, U), out.shape
    max_err = float(jnp.max(jnp.abs(out - ref)))
    assert jnp.allclose(out, ref, atol=5e-3, rtol=5e-3), \
        f"f32 mismatch vs reference (max abs err {max_err})"

    # --- bf16-HBM path (review item for v6e/v7x): bf16 reads/writes, f32 accumulate.
    # Also exercises the inner sub-chunk loop and a multi-tile grid (grid (2, 2)).
    out_bf16 = feats_upsample_layer(
        feats, w1, b1, w2, b2, U,
        n_tile=512, sub_tile=128,
        matmul_dtype=jnp.bfloat16, out_dtype=jnp.bfloat16)
    out_bf16 = jax.block_until_ready(out_bf16)
    assert out_bf16.shape == (B, D, N, U), out_bf16.shape
    max_err_bf16 = float(jnp.max(jnp.abs(out_bf16.astype(jnp.float32) - ref)))
    assert jnp.allclose(out_bf16.astype(jnp.float32), ref, atol=5e-2, rtol=5e-2), \
        f"bf16 mismatch vs reference (max abs err {max_err_bf16})"

    print("KERNEL_OK")
</pallas_src>

<mosaic_0001>
module attributes {stable_mosaic.version = 11 : i64} {
  func.func @kernel(%arg0: i32, %arg1: i32, %arg2: memref<1x8x512xf32, #tpu.memory_space<vmem>>, %arg3: memref<128x8xf32, #tpu.memory_space<vmem>>, %arg4: memref<128x1xf32, #tpu.memory_space<vmem>>, %arg5: memref<32x128xf32, #tpu.memory_space<vmem>>, %arg6: memref<32x1xf32, #tpu.memory_space<vmem>>, %arg7: memref<1x32x512xf32, #tpu.memory_space<vmem>>) attributes {dimension_semantics = [#tpu.dimension_semantics<parallel>, #tpu.dimension_semantics<parallel>], iteration_bounds = array<i64: 2, 1>, scalar_prefetch = 0 : i64, scratch_operands = 0 : i64, tpu.core_type = #tpu.core_type<tc>, window_params = [{transform_indices = @transform_0, window_bounds = array<i64: 1, 8, 512>}, {pipeline_mode = #tpu.pipeline_mode<synchronous>, transform_indices = @transform_1, window_bounds = array<i64: 128, 8>}, {pipeline_mode = #tpu.pipeline_mode<synchronous>, transform_indices = @transform_2, window_bounds = array<i64: 128, 1>}, {pipeline_mode = #tpu.pipeline_mode<synchronous>, transform_indices = @transform_3, window_bounds = array<i64: 32, 128>}, {pipeline_mode = #tpu.pipeline_mode<synchronous>, transform_indices = @transform_4, window_bounds = array<i64: 32, 1>}, {transform_indices = @transform_5, window_bounds = array<i64: 1, 32, 512>}]} {
    %c0 = arith.constant 0 : index
    %c0_0 = arith.constant 0 : index
    %0 = vector.load %arg3[%c0, %c0_0] : memref<128x8xf32, #tpu.memory_space<vmem>>, vector<128x8xf32>
    %c0_1 = arith.constant 0 : index
    %c0_2 = arith.constant 0 : index
    %1 = vector.load %arg4[%c0_1, %c0_2] : memref<128x1xf32, #tpu.memory_space<vmem>>, vector<128x1xf32>
    %c0_3 = arith.constant 0 : index
    %c0_4 = arith.constant 0 : index
    %2 = vector.load %arg5[%c0_3, %c0_4] : memref<32x128xf32, #tpu.memory_space<vmem>>, vector<32x128xf32>
    %c0_5 = arith.constant 0 : index
    %c0_6 = arith.constant 0 : index
    %3 = vector.load %arg6[%c0_5, %c0_6] : memref<32x1xf32, #tpu.memory_space<vmem>>, vector<32x1xf32>
    %c0_7 = arith.constant 0 : index
    %c0_8 = arith.constant 0 : index
    %c0_9 = arith.constant 0 : index
    %4 = vector.load %arg2[%c0_7, %c0_8, %c0_9] : memref<1x8x512xf32, #tpu.memory_space<vmem>>, vector<1x8x512xf32>
    %5 = vector.shape_cast %4 : vector<1x8x512xf32> to vector<8x512xf32>
    %cst = arith.constant dense<0.000000e+00> : vector<128x512xf32>
    %6 = tpu.matmul %0, %5, %cst {dimension_numbers = #tpu.dot_dimension_numbers<[1], [0], [0], [1], [0, 0, 1, 1], [], []>} : vector<128x8xf32>, vector<8x512xf32>, vector<128x512xf32> -> vector<128x512xf32>
    %7 = vector.broadcast %1 : vector<128x1xf32> to vector<128x512xf32>
    %8 = arith.addf %6, %7 : vector<128x512xf32>
    %cst_10 = arith.constant 0.000000e+00 : f32
    %9 = vector.broadcast %cst_10 : f32 to vector<128x512xf32>
    %10 = arith.maximumf %8, %9 : vector<128x512xf32>
    %cst_11 = arith.constant dense<0.000000e+00> : vector<32x512xf32>
    %11 = tpu.matmul %2, %10, %cst_11 {dimension_numbers = #tpu.dot_dimension_numbers<[1], [0], [0], [1], [0, 0, 1, 1], [], []>} : vector<32x128xf32>, vector<128x512xf32>, vector<32x512xf32> -> vector<32x512xf32>
    %12 = vector.broadcast %3 : vector<32x1xf32> to vector<32x512xf32>
    %13 = arith.addf %11, %12 : vector<32x512xf32>
    %14 = vector.shape_cast %13 : vector<32x512xf32> to vector<4x8x512xf32>
    %15 = vector.shape_cast %5 : vector<8x512xf32> to vector<1x8x512xf32>
    %16 = vector.broadcast %15 : vector<1x8x512xf32> to vector<4x8x512xf32>
    %17 = arith.addf %14, %16 : vector<4x8x512xf32>
    %18 = vector.shape_cast %17 : vector<4x8x512xf32> to vector<32x512xf32>
    %c0_12 = arith.constant 0 : index
    %c0_13 = arith.constant 0 : index
    %c0_14 = arith.constant 0 : index
    %19 = vector.load %arg7[%c0_12, %c0_13, %c0_14] : memref<1x32x512xf32, #tpu.memory_space<vmem>>, vector<1x32x512xf32>
    %20 = vector.shape_cast %19 : vector<1x32x512xf32> to vector<32x512xf32>
    %21 = vector.shape_cast %18 : vector<32x512xf32> to vector<1x32x512xf32>
    tpu.vector_store %arg7[%c0_12, %c0_13, %c0_14], %21 {strides = array<i32>} : memref<1x32x512xf32, #tpu.memory_space<vmem>>, vector<1x32x512xf32>,
    return
  }
  func.func @transform_0(%arg0: i32, %arg1: i32) -> (i32, i32, i32) {
    %c0_i32 = arith.constant 0 : i32
    %c0_i32_0 = arith.constant 0 : i32
    return %arg0, %c0_i32, %arg1 : i32, i32, i32
  }
  func.func @transform_1(%arg0: i32, %arg1: i32) -> (i32, i32) {
    %c0_i32 = arith.constant 0 : i32
    %c0_i32_0 = arith.constant 0 : i32
    %c0_i32_1 = arith.constant 0 : i32
    return %c0_i32, %c0_i32_0 : i32, i32
  }
  func.func @transform_2(%arg0: i32, %arg1: i32) -> (i32, i32) {
    %c0_i32 = arith.constant 0 : i32
    %c0_i32_0 = arith.constant 0 : i32
    %c0_i32_1 = arith.constant 0 : i32
    return %c0_i32, %c0_i32_0 : i32, i32
  }
  func.func @transform_3(%arg0: i32, %arg1: i32) -> (i32, i32) {
    %c0_i32 = arith.constant 0 : i32
    %c0_i32_0 = arith.constant 0 : i32
    %c0_i32_1 = arith.constant 0 : i32
    return %c0_i32, %c0_i32_0 : i32, i32
  }
  func.func @transform_4(%arg0: i32, %arg1: i32) -> (i32, i32) {
    %c0_i32 = arith.constant 0 : i32
    %c0_i32_0 = arith.constant 0 : i32
    %c0_i32_1 = arith.constant 0 : i32
    return %c0_i32, %c0_i32_0 : i32, i32
  }
  func.func @transform_5(%arg0: i32, %arg1: i32) -> (i32, i32, i32) {
    %c0_i32 = arith.constant 0 : i32
    %c0_i32_0 = arith.constant 0 : i32
    return %arg0, %c0_i32, %arg1 : i32, i32, i32
  }
}

</mosaic_0001>

<bundles_post_ra>
// kernel: tpu_custom_call.1
= control target key start
LH: loop header
LB: loop body
LE: loop exit
PB: predicated region body
PF: predicated region fallthrough
CT: control target
= control target key end

     0   :  { %10 = vsyncpa [#allocation3], 0  ;;  %s1860_s0 = inlined_call_operand.vmem [shape: f32[2,8,512], index: 0, kind: input, shape index: {}]   ;;  %s1861_s1 = inlined_call_operand.vmem [shape: f32[128,8], index: 1, kind: input, shape index: {}]   ;;  %s1862_s2 = inlined_call_operand.vmem [shape: f32[128,1], index: 2, kind: input, shape index: {}]   ;;  %s1863_s3 = inlined_call_operand.vmem [shape: f32[32,128], index: 3, kind: input, shape index: {}]   ;;  %s1864_s4 = inlined_call_operand.vmem [shape: f32[32,1], index: 4, kind: input, shape index: {}]   ;;  %s1865_s5 = inlined_call_operand.hbm [shape: f32[2,32,512], index: 5, kind: output, shape index: {}]  }
   0x1   :  { %12 = vsyncpa [#allocation3 + $0x1], 0  ;;  %s1359_s18 = smov 0   ;;  %s1361_s19 = smov 0  }
   0x2   :  { %s1363_s20 = smov 0   ;;  %s1365_s21 = smov 0  }
   0x3   :  { %s1367_s22 = smov 0   ;;  %s1369_s23 = smov 0  }
   0x4 LB: > { %s1138_s24 = sadd.s32 4294967295, %s1322_s23   ;;  %s1139_s25 = sadd.s32 4294967294, %s1322_s23   ;;  %s1322_s23 = sphi %s1369_s23, %s18_s23   ;;  %s1318_s22 = sphi %s1367_s22, %s1943_s22   ;;  %s1314_s21 = sphi %s1365_s21, %s1942_s21   ;;  %s1310_s20 = sphi %s1363_s20, %s1941_s20   ;;  %s1306_s19 = sphi %s1361_s19, %s1940_s19   ;;  %s1302_s18 = sphi %s1359_s18, %s1939_s18  }
   0x5   : > { %s30_s26 = sadd.s32 1, %s1318_s22  ;;  %s151_s27 = sadd.s32 1, %s1310_s20 }
   0x6   : > { %p32_p0 = scmp.ge.s32.totalorder %s30_s26, 2  ;;  %p161_p1 = scmp.ne.s32.totalorder %s1310_s20, %s1306_s19 }
   0x7   : > { %p162_p2 = scmp.eq.s32.totalorder %s1138_s24, 1  ;;  %p167_p3 = scmp.ne.s32.totalorder %s1306_s19, %s1302_s18 }
   0x8   : > { %s1945_s26 = smov (%p32_p0, %s30_s26), 0  ;;  %p168_p5 = scmp.eq.s32.totalorder %s1139_s25, 1 }
   0x9   : > { %p1399_p4 = por %p162_p2, %p161_p1  ;;  %s146_s29 = ssub.s32 %s1318_s22, %s1945_s26 }
   0xa   : > { %p1142_p6 = scmp.ge.s32.totalorder %s1322_s23, 1  ;;  %p149_p7 = scmp.eq.s32.totalorder %s146_s29, 0 }
   0xb   : > { %p1406_p8 = por %p168_p5, %p167_p3  ;;  %p211_p9 = scmp.lt.s32.totalorder %s1322_s23, 3 }
   0xc   : > { %s1412_s6 = scalar_select %p149_p7, %s1310_s20, %s151_s27  }
   0xd   : > { %p212_p10 = pnand %p1142_p6, %p211_p9 }
   0xf   : > { %215 = sbr.rel (%p212_p10) target bundleno = 545 (0x221), region = 40 }
  0x14   : > { %p244_p11 = scmp.lt.s32.totalorder %s1314_s21, 1  ;;  %v1866_v0 = vmov 0.0   ;;  %v1325_v1 = vmov 0   ;;  %v283_v2 = vld [vmem:[%s1862_s2 + $0x68] sm:$0xff]  ;;  %v285_v3 = vld [vmem:[%s1862_s2 + $0x78] sm:$0xff]  ;;  %v254_v4 = vld [vmem:[%s1861_s1] sm:$0xff] }
  0x15   : > { %491 = vmatprep.mubr.f32.mxu0 %v1866_v0  ;;  %652 = vmatprep.mubr.f32.mxu1 %v1866_v0  ;;  %vm378_vm0 = vcmask 64512   ;;  %v282_v9 = vld [vmem:[%s1862_s2 + $0x60] sm:$0xff]  ;;  %v284_v10 = vld [vmem:[%s1862_s2 + $0x70] sm:$0xff]  ;;  %v255_v11 = vld [vmem:[%s1861_s1 + $0x8] sm:$0xff]  ;;  %s240_s17 = sand.u32 1, %s1306_s19   ;;  %s1184_s27 = sshll.u32 %s1314_s21, 11 }
  0x16   : > { %s245_s7 = scalar_select %p244_p11, %s1314_s21, 1  ;;  %1245 = vset.pattern.permute.xlu1 %v1325_v1  ;;  %1244 = vset.pattern.permute.xlu0 %v1325_v1  ;;  %v280_v12 = vld [vmem:[%s1862_s2 + $0x50] sm:$0xff]  ;;  %v281_v13 = vld [vmem:[%s1862_s2 + $0x58] sm:$0xff]  ;;  %v278_v15 = vld [vmem:[%s1862_s2 + $0x40] sm:$0xff] }
  0x17   : > { %365 = vperm.xlu1 %1245, %v283_v2   ;;  %375 = vperm.xlu0 %1244, %v285_v3   ;;  %v256_v14 = vld [vmem:[%s1861_s1 + $0x10] sm:$0xff]  ;;  %v279_v16 = vld [vmem:[%s1862_s2 + $0x48] sm:$0xff]  ;;  %v257_v17 = vld [vmem:[%s1861_s1 + $0x18] sm:$0xff]  ;;  %s1143_s24 = sshll.u32 %s240_s17, 7  ;;  %s1803_s9 = scalar_lea.hbm %s1865_s5, %s1184_s27 }
  0x18   : > { %s1183_s10 = sshll.u32 %s245_s7, 5  ;;  %v276_v18 = vld [vmem:[%s1862_s2 + $0x30] sm:$0xff]  ;;  %v277_v19 = vld [vmem:[%s1862_s2 + $0x38] sm:$0xff]  ;;  %v258_v20 = vld [vmem:[%s1861_s1 + $0x20] sm:$0xff]  ;;  %s1772_s25 = scalar_lea.vmem [#allocation2], %s1143_s24 }
  0x19   : > { %s251_s15 = scalar_lea.vmem %s1860_s0, %s1183_s10  ;;  %v274_v21 = vld [vmem:[%s1862_s2 + $0x20] sm:$0xff]  ;;  %v275_v22 = vld [vmem:[%s1862_s2 + $0x28] sm:$0xff]  ;;  %v272_v24 = vld [vmem:[%s1862_s2 + $0x10] sm:$0xff]  ;;  %s1059_s29 = sshll.u32 %s1772_s25, 4  ;;  %s1805_s29 = int_to_ptr.vmem [resolvable:$true] %s1059_s29 }
  0x1a   : > { %v1430_v5 = vld [vmem:[%s251_s15 + $0x8] sm:$0xff]  ;;  %v1432_v6 = vld [vmem:[%s251_s15 + $0x18] sm:$0xff]  ;;  %v1434_v7 = vld [vmem:[%s251_s15] sm:$0xff]  ;;  %s1815_s21 = scalar_lea.sflag [#allocation3], %s240_s17  ;;  %s1246_s10 = scalar_lea.vmem %s1805_s29, 2048 }
  0x1b   : > { %1878 = vst [vmem:[#allocation5_spill] sm:$0xff] %v1430_v5  ;;  %1879 = vst [vmem:[#allocation6_spill] sm:$0xff] %v1432_v6  ;;  %457 = vmatprep.subr.mxu0 %v1430_v5  ;;  %618 = vmatprep.subr.mxu1 %v1432_v6  ;;  %v1438_v8 = vld [vmem:[%s251_s15 + $0x10] sm:$0xff]  ;;  %v259_v23 = vld [vmem:[%s1861_s1 + $0x28] sm:$0xff]  ;;  %p1247_p12 = scmp.ne.s32.totalorder %s1805_s29, %s1246_s10  ;;  %s1326_s11 = smov [#allocation2]  }
  0x1c   : > { %1880 = vst [vmem:[#allocation7_spill] sm:$0xff] %v1434_v7  ;;  %1881 = vst [vmem:[#allocation8_spill] sm:$0xff] %v1438_v8  ;;  %458 = vmatpush1.msra.mxu0 %v1434_v7  ;;  %619 = vmatpush1.msra.mxu1 %v1438_v8  ;;  %v273_v25 = vld [vmem:[%s1862_s2 + $0x18] sm:$0xff]  ;;  %v260_v26 = vld [vmem:[%s1861_s1 + $0x30] sm:$0xff]  ;;  %s1250_s12 = sshll.u32 %s1326_s11, 4  ;;  %s1251_s12 = int_to_ptr.vmem [resolvable:$false] %s1250_s12 }
  0x1d   : > { %1146 = vmatmul.mubr.msk.f32.vlgmr.msra.gmra.mxu0 %vm378_vm0, %v254_v4  ;;  %1162 = vmatmul.mubr.msk.f32.vlgmr.msra.gmra.mxu1 %vm378_vm0, %v254_v4  ;;  %v270_v27 = vld [vmem:[%s1862_s2] sm:$0xff]  ;;  %v271_v28 = vld [vmem:[%s1862_s2 + $0x8] sm:$0xff]  ;;  %v261_v29 = vld [vmem:[%s1861_s1 + $0x38] sm:$0xff]  ;;  %p1248_p13 = pnand %p1247_p12, %p1399_p4  ;;  %s1252_s13 = scalar_lea.vmem %s1251_s12, 4096 }
  0x1e   : > { %497 = vmatprep.mubr.f32.mxu0 %v1866_v0  ;;  %658 = vmatprep.mubr.f32.mxu1 %v1866_v0  ;;  %v290_v30 = vld [vmem:[%s1864_s4] sm:$0xff]  ;;  %v291_v31 = vld [vmem:[%s1864_s4 + $0x8] sm:$0xff]  ;;  %v292_v33 = vld [vmem:[%s1864_s4 + $0x10] sm:$0xff]  ;;  %p1253_p1 = scmp.lt.s32.totalorder %s1805_s29, %s1251_s12  ;;  %p1254_p2 = scmp.lt.s32.totalorder %s1252_s13, %s1246_s10 }
  0x1f   : > { %360 = vperm.xlu1 %1245, %v282_v9   ;;  %370 = vperm.xlu0 %1244, %v284_v10   ;;  %v262_v32 = vld [vmem:[%s1861_s1 + $0x40] sm:$0xff]  ;;  %v293_v34 = vld [vmem:[%s1864_s4 + $0x18] sm:$0xff]  ;;  %v263_v35 = vld [vmem:[%s1861_s1 + $0x48] sm:$0xff]  ;;  %p1249_p0 = pneg %p1248_p13 }
  0x20   : > { %v264_v36 = vld [vmem:[%s1861_s1 + $0x50] sm:$0xff]  ;;  %v265_v37 = vld [vmem:[%s1861_s1 + $0x58] sm:$0xff]  ;;  %v266_v38 = vld [vmem:[%s1861_s1 + $0x60] sm:$0xff]  ;;  %p1255_p3 = por %p1254_p2, %p1253_p1 }
  0x21   : > { %1147 = vmatmul.mubr.msk.f32.gmra.mxu0 %vm378_vm0, %v255_v11  ;;  %1163 = vmatmul.mubr.msk.f32.gmra.mxu1 %vm378_vm0, %v255_v11  ;;  %v267_v39 = vld [vmem:[%s1861_s1 + $0x68] sm:$0xff]  ;;  %v268_v40 = vld [vmem:[%s1861_s1 + $0x70] sm:$0xff]  ;;  %v269_v41 = vld [vmem:[%s1861_s1 + $0x78] sm:$0xff] }
  0x22   : > { %503 = vmatprep.mubr.f32.mxu0 %v1866_v0  ;;  %664 = vmatprep.mubr.f32.mxu1 %v1866_v0  ;;  %p1256_p5 = pnand %p1255_p3, %p1249_p0 }
  0x23   : > { %350 = vperm.xlu1 %1245, %v280_v12   ;;  %355 = vperm.xlu0 %1244, %v281_v13  }
  0x25   : > { %1148 = vmatmul.mubr.msk.f32.gmra.mxu0 %vm378_vm0, %v256_v14  ;;  %1164 = vmatmul.mubr.msk.f32.gmra.mxu1 %vm378_vm0, %v256_v14 }
  0x26   : > { %509 = vmatprep.mubr.f32.mxu0 %v1866_v0  ;;  %670 = vmatprep.mubr.f32.mxu1 %v1866_v0 }
  0x27   : > { %340 = vperm.xlu1 %1245, %v278_v15   ;;  %345 = vperm.xlu0 %1244, %v279_v16  }
  0x29   : > { %1149 = vmatmul.mubr.msk.f32.gmra.mxu0 %vm378_vm0, %v257_v17  ;;  %1165 = vmatmul.mubr.msk.f32.gmra.mxu1 %vm378_vm0, %v257_v17 }
  0x2a   : > { %515 = vmatprep.mubr.f32.mxu0 %v1866_v0  ;;  %676 = vmatprep.mubr.f32.mxu1 %v1866_v0 }
  0x2b   : > { %330 = vperm.xlu1 %1245, %v276_v18   ;;  %335 = vperm.xlu0 %1244, %v277_v19  }
  0x2d   : > { %1150 = vmatmul.mubr.msk.f32.gmra.mxu0 %vm378_vm0, %v258_v20  ;;  %1166 = vmatmul.mubr.msk.f32.gmra.mxu1 %vm378_vm0, %v258_v20 }
  0x2e   : > { %521 = vmatprep.mubr.f32.mxu0 %v1866_v0  ;;  %682 = vmatprep.mubr.f32.mxu1 %v1866_v0 }
  0x2f   : > { %320 = vperm.xlu1 %1245, %v274_v21   ;;  %325 = vperm.xlu0 %1244, %v275_v22  }
  0x31   : > { %1151 = vmatmul.mubr.msk.f32.gmra.mxu0 %vm378_vm0, %v259_v23  ;;  %1167 = vmatmul.mubr.msk.f32.gmra.mxu1 %vm378_vm0, %v259_v23 }
  0x32   : > { %527 = vmatprep.mubr.f32.mxu0 %v1866_v0  ;;  %688 = vmatprep.mubr.f32.mxu1 %v1866_v0 }
  0x33   : > { %310 = vperm.xlu1 %1245, %v272_v24   ;;  %315 = vperm.xlu0 %1244, %v273_v25  }
  0x35   : > { %1152 = vmatmul.mubr.msk.f32.gmra.mxu0 %vm378_vm0, %v260_v26  ;;  %1168 = vmatmul.mubr.msk.f32.gmra.mxu1 %vm378_vm0, %v260_v26 }
  0x36   : > { %533 = vmatprep.mubr.f32.mxu0 %v1866_v0  ;;  %694 = vmatprep.mubr.f32.mxu1 %v1866_v0 }
  0x37   : > { %300 = vperm.xlu1 %1245, %v270_v27   ;;  %305 = vperm.xlu0 %1244, %v271_v28  }
  0x39   : > { %1153 = vmatmul.mubr.msk.f32.gmra.mxu0 %vm378_vm0, %v261_v29  ;;  %1169 = vmatmul.mubr.msk.f32.gmra.mxu1 %vm378_vm0, %v261_v29 }
  0x3a   : > { %539 = vmatprep.mubr.f32.mxu0 %v1866_v0  ;;  %700 = vmatprep.mubr.f32.mxu1 %v1866_v0 }
  0x3b   : > { %815 = vperm.xlu0 %1244, %v290_v30   ;;  %820 = vperm.xlu1 %1245, %v291_v31  }
  0x3d   : > { %1154 = vmatmul.mubr.msk.f32.gmra.mxu0 %vm378_vm0, %v262_v32  ;;  %1170 = vmatmul.mubr.msk.f32.gmra.mxu1 %vm378_vm0, %v262_v32 }
  0x3e   : > { %545 = vmatprep.mubr.f32.mxu0 %v1866_v0  ;;  %706 = vmatprep.mubr.f32.mxu1 %v1866_v0 }
  0x3f   : > { %825 = vperm.xlu0 %1244, %v292_v33   ;;  %830 = vperm.xlu1 %1245, %v293_v34  }
  0x41   : > { %1155 = vmatmul.mubr.msk.f32.gmra.mxu0 %vm378_vm0, %v263_v35  ;;  %1171 = vmatmul.mubr.msk.f32.gmra.mxu1 %vm378_vm0, %v263_v35 }
  0x42   : > { %551 = vmatprep.mubr.f32.mxu0 %v1866_v0  ;;  %712 = vmatprep.mubr.f32.mxu1 %v1866_v0 }
  0x45   : > { %1156 = vmatmul.mubr.msk.f32.gmra.mxu0 %vm378_vm0, %v264_v36  ;;  %1172 = vmatmul.mubr.msk.f32.gmra.mxu1 %vm378_vm0, %v264_v36 }
  0x46   : > { %557 = vmatprep.mubr.f32.mxu0 %v1866_v0  ;;  %718 = vmatprep.mubr.f32.mxu1 %v1866_v0 }
  0x49   : > { %1157 = vmatmul.mubr.msk.f32.gmra.mxu0 %vm378_vm0, %v265_v37  ;;  %1173 = vmatmul.mubr.msk.f32.gmra.mxu1 %vm378_vm0, %v265_v37 }
  0x4a   : > { %563 = vmatprep.mubr.f32.mxu0 %v1866_v0  ;;  %724 = vmatprep.mubr.f32.mxu1 %v1866_v0 }
  0x4d   : > { %1158 = vmatmul.mubr.msk.f32.gmra.mxu0 %vm378_vm0, %v266_v38  ;;  %1174 = vmatmul.mubr.msk.f32.gmra.mxu1 %vm378_vm0, %v266_v38 }
  0x4e   : > { %569 = vmatprep.mubr.f32.mxu0 %v1866_v0  ;;  %730 = vmatprep.mubr.f32.mxu1 %v1866_v0 }
  0x51   : > { %1159 = vmatmul.mubr.msk.f32.gmra.mxu0 %vm378_vm0, %v267_v39  ;;  %1175 = vmatmul.mubr.msk.f32.gmra.mxu1 %vm378_vm0, %v267_v39 }
  0x52   : > { %575 = vmatprep.mubr.f32.mxu0 %v1866_v0  ;;  %736 = vmatprep.mubr.f32.mxu1 %v1866_v0 }
  0x55   : > { %1160 = vmatmul.mubr.msk.f32.gmra.mxu0 %vm378_vm0, %v268_v40  ;;  %1176 = vmatmul.mubr.msk.f32.gmra.mxu1 %vm378_vm0, %v268_v40 }
  0x56   : > { %581 = vmatprep.mubr.f32.mxu0 %v1866_v0  ;;  %742 = vmatprep.mubr.f32.mxu1 %v1866_v0 }
  0x59   : > { %1161 = vmatmul.mubr.msk.f32.gmra.mxu0 %vm378_vm0, %v269_v41  ;;  %1177 = vmatmul.mubr.msk.f32.gmra.mxu1 %vm378_vm0, %v269_v41 }
  0x5a   : > { %897 = vmatprep.mubr.f32.mxu0 %v1866_v0  ;;  %986 = vmatprep.mubr.f32.mxu1 %v1866_v0 }
  0x92   : > { %v376_v29 = vpop.permute.xlu0 %375  ;;  %v366_v32 = vpop.permute.xlu1 %365 }
  0x9a   : > { %v371_v37 = vpop.permute.xlu0 %370  ;;  %v361_v40 = vpop.permute.xlu1 %360 }
  0x9e   : > { %v356_v8 = vpop.permute.xlu0 %355 }
  0xdd   : > { %v1605_v42 = vpop.f32.mrf.mxu0  ;;  %v1607_v43 = vpop.f32.mrf.mxu1 }
  0xde   : > { %1882 = vst [vmem:[#allocation9_spill] sm:$0xff] %v1605_v42  ;;  %1883 = vst [vmem:[#allocation10_spill] sm:$0xff] %v1607_v43  ;;  %v351_v42 = vpop.permute.xlu1 %350 }
  0xdf   : > { %v1609_v44 = vpop.f32.mrf.mxu0  ;;  %v1611_v45 = vpop.f32.mrf.mxu1 }
  0xe0   : > { %1884 = vst [vmem:[#allocation11_spill] sm:$0xff] %v1609_v44  ;;  %1885 = vst [vmem:[#allocation12_spill] sm:$0xff] %v1611_v45 }
  0xe1   : > { %v1613_v46 = vpop.f32.mrf.mxu0  ;;  %v1615_v47 = vpop.f32.mrf.mxu1 }
  0xe2   : > { %1886 = vst [vmem:[#allocation13_spill] sm:$0xff] %v1613_v46  ;;  %1887 = vst [vmem:[#allocation14_spill] sm:$0xff] %v1615_v47 }
  0xe3   : > { %v1617_v48 = vpop.f32.mrf.mxu0  ;;  %v1619_v49 = vpop.f32.mrf.mxu1 }
  0xe4   : > { %1888 = vst [vmem:[#allocation15_spill] sm:$0xff] %v1617_v48  ;;  %1889 = vst [vmem:[#allocation16_spill] sm:$0xff] %v1619_v49 }
  0xe5   : > { %v1621_v50 = vpop.f32.mrf.mxu0  ;;  %v1623_v51 = vpop.f32.mrf.mxu1 }
  0xe6   : > { %1890 = vst [vmem:[#allocation17_spill] sm:$0xff] %v1621_v50  ;;  %1891 = vst [vmem:[#allocation18_spill] sm:$0xff] %v1623_v51  ;;  %v346_v51 = vpop.permute.xlu0 %345 }
  0xe7   : > { %v1625_v52 = vpop.f32.mrf.mxu0  ;;  %v1627_v53 = vpop.f32.mrf.mxu1 }
  0xe8   : > { %1892 = vst [vmem:[#allocation19_spill] sm:$0xff] %v1625_v52  ;;  %1893 = vst [vmem:[#allocation20_spill] sm:$0xff] %v1627_v53 }
  0xe9   : > { %v1629_v54 = vpop.f32.mrf.mxu0  ;;  %v1631_v55 = vpop.f32.mrf.mxu1 }
  0xea   : > { %1894 = vst [vmem:[#allocation21_spill] sm:$0xff] %v1629_v54  ;;  %1895 = vst [vmem:[#allocation22_spill] sm:$0xff] %v1631_v55 }
  0xeb   : > { %v1633_v56 = vpop.f32.mrf.mxu0  ;;  %v1635_v57 = vpop.f32.mrf.mxu1 }
  0xec   : > { %1896 = vst [vmem:[#allocation23_spill] sm:$0xff] %v1633_v56  ;;  %1897 = vst [vmem:[#allocation24_spill] sm:$0xff] %v1635_v57  ;;  %v1697_v56 = vpop.permute.xlu1 %340 }
  0xed   : > { %v1637_v58 = vpop.f32.mrf.mxu0  ;;  %v1639_v59 = vpop.f32.mrf.mxu1 }
  0xee   : > { %1898 = vst [vmem:[#allocation25_spill] sm:$0xff] %v1637_v58  ;;  %1899 = vst [vmem:[#allocation26_spill] sm:$0xff] %v1639_v59 }
  0xef   : > { %v1641_v60 = vpop.f32.mrf.mxu0  ;;  %v1643_v61 = vpop.f32.mrf.mxu1 }
  0xf0   : > { %1900 = vst [vmem:[#allocation27_spill] sm:$0xff] %v1641_v60  ;;  %1901 = vst [vmem:[#allocation28_spill] sm:$0xff] %v1643_v61 }
  0xf1   : > { %v1645_v62 = vpop.f32.mrf.mxu0  ;;  %v1647_v63 = vpop.f32.mrf.mxu1 }
  0xf2   : > { %1902 = vst [vmem:[#allocation29_spill] sm:$0xff] %v1645_v62  ;;  %1903 = vst [vmem:[#allocation30_spill] sm:$0xff] %v1647_v63 }
  0xf3   : > { %v1649_v1 = vpop.f32.mrf.mxu0  ;;  %v1651_v2 = vpop.f32.mrf.mxu1 }
  0xf4   : > { %1904 = vst [vmem:[#allocation31_spill] sm:$0xff] %v1649_v1  ;;  %1905 = vst [vmem:[#allocation32_spill] sm:$0xff] %v1651_v2 }
  0xf5   : > { %v1653_v3 = vpop.f32.mrf.mxu0  ;;  %v1655_v4 = vpop.f32.mrf.mxu1 }
  0xf6   : > { %1906 = vst [vmem:[#allocation33_spill] sm:$0xff] %v1653_v3  ;;  %1907 = vst [vmem:[#allocation34_spill] sm:$0xff] %v1655_v4 }
  0xf7   : > { %v1657_v9 = vpop.f32.mrf.mxu0  ;;  %v1659_v10 = vpop.f32.mrf.mxu1 }
  0xf9   : > { %v1661_v11 = vpop.f32.mrf.mxu0  ;;  %v1663_v12 = vpop.f32.mrf.mxu1 }
  0xfb   : > { %v1665_v13 = vpop.f32.mrf.mxu0  ;;  %v1667_v14 = vpop.f32.mrf.mxu1 }
  0xfd   : > { %v1669_v15 = vpop.f32.mrf.mxu0  ;;  %v1671_v16 = vpop.f32.mrf.mxu1 }
  0xff   : > { %v1673_v17 = vpop.f32.mrf.mxu0  ;;  %v1675_v18 = vpop.f32.mrf.mxu1 }
 0x101   : > { %v1677_v19 = vpop.f32.mrf.mxu0  ;;  %v1679_v20 = vpop.f32.mrf.mxu1 }
 0x103   : > { %v1681_v21 = vpop.f32.mrf.mxu0  ;;  %v1683_v22 = vpop.f32.mrf.mxu1 }
 0x105   : > { %v1685_v23 = vpop.f32.mrf.mxu0  ;;  %v1687_v24 = vpop.f32.mrf.mxu1 }
 0x107   : > { %v1689_v25 = vpop.f32.mrf.mxu0  ;;  %v1691_v26 = vpop.f32.mrf.mxu1 }
 0x109   : > { %v1693_v27 = vpop.f32.mrf.mxu0  ;;  %v1695_v28 = vpop.f32.mrf.mxu1 }
 0x10b   : > { %v561_v30 = vpop.f32.mrf.mxu0  ;;  %v722_v31 = vpop.f32.mrf.mxu1 }
 0x10d   : > { %v565_v33 = vpop.f32.mrf.mxu0  ;;  %v726_v34 = vpop.f32.mrf.mxu1 }
 0x10f   : > { %v567_v35 = vpop.f32.mrf.mxu0  ;;  %v728_v36 = vpop.f32.mrf.mxu1 }
 0x110   : > { %v729_v1 = vadd.f32 %v728_v36, %v361_v40 }
 0x111   : > { %v571_v38 = vpop.f32.mrf.mxu0  ;;  %v732_v39 = vpop.f32.mrf.mxu1 }
 0x112   : > { %v572_v63 = vadd.f32 %v571_v38, %v366_v32  ;;  %v733_v62 = vadd.f32 %v732_v39, %v366_v32  ;;  %v1909_v38 = vld [vmem:[#allocation34_spill] sm:$0xff] }
 0x113   : > { %v573_v41 = vpop.f32.mrf.mxu0  ;;  %v734_v0 = vpop.f32.mrf.mxu1 }
 0x114   : > { %v574_v59 = vadd.f32 %v573_v41, %v366_v32  ;;  %v735_v58 = vadd.f32 %v734_v0, %v366_v32  ;;  %v562_v0 = vadd.f32 %v561_v30, %v356_v8  ;;  %v1910_v41 = vld [vmem:[#allocation31_spill] sm:$0xff] }
 0x115   : > { %v577_v6 = vpop.f32.mrf.mxu0  ;;  %v738_v5 = vpop.f32.mrf.mxu1 }
 0x116   : > { %v578_v54 = vadd.f32 %v577_v6, %v371_v37  ;;  %v739_v57 = vadd.f32 %v738_v5, %v371_v37 }
 0x117   : > { %v579_v7 = vpop.f32.mrf.mxu0  ;;  %v740_v43 = vpop.f32.mrf.mxu1 }
 0x118   : > { %v580_v50 = vadd.f32 %v579_v7, %v371_v37  ;;  %v741_v53 = vadd.f32 %v740_v43, %v371_v37  ;;  %v566_v7 = vadd.f32 %v565_v33, %v361_v40  ;;  %v727_v43 = vadd.f32 %v726_v34, %v361_v40 }
 0x119   : > { %v583_v45 = vpop.f32.mrf.mxu0  ;;  %v744_v44 = vpop.f32.mrf.mxu1  ;;  %v805_v6 = vmax.f32 %v578_v54, 0.0  ;;  %v807_v5 = vmax.f32 %v739_v57, 0.0  ;;  %v556_v54 = vadd.f32 %v1689_v25, %v351_v42  ;;  %v717_v57 = vadd.f32 %v1691_v26, %v351_v42 }
 0x11a   : > { %v584_v47 = vadd.f32 %v583_v45, %v376_v29  ;;  %v745_v46 = vadd.f32 %v744_v44, %v376_v29  ;;  %v568_v44 = vadd.f32 %v567_v35, %v361_v40  ;;  %v806_v4 = vmax.f32 %v580_v50, 0.0 }
 0x11b   : > { %v585_v49 = vpop.f32.mrf.mxu0  ;;  %v746_v48 = vpop.f32.mrf.mxu1  ;;  %v808_v3 = vmax.f32 %v741_v53, 0.0  ;;  %v801_v50 = vmax.f32 %v572_v63, 0.0  ;;  %v803_v53 = vmax.f32 %v733_v62, 0.0  ;;  %v711_v62 = vadd.f32 %v1683_v22, %v346_v51 }
 0x11c   : > { %v586_v52 = vadd.f32 %v585_v49, %v376_v29  ;;  %v747_v55 = vadd.f32 %v746_v48, %v376_v29  ;;  %v809_v2 = vmax.f32 %v584_v47, 0.0  ;;  %v811_v45 = vmax.f32 %v745_v46, 0.0  ;;  %v336_v48 = vpop.permute.xlu0 %335 }
 0x11d   : > { %v723_v49 = vadd.f32 %v722_v31, %v356_v8  ;;  %v560_v46 = vadd.f32 %v1693_v27, %v356_v8  ;;  %v721_v47 = vadd.f32 %v1695_v28, %v356_v8  ;;  %v550_v8 = vadd.f32 %v1681_v21, %v346_v51 }
 0x11e   : > { %v810_v61 = vmax.f32 %v586_v52, 0.0  ;;  %v812_v60 = vmax.f32 %v747_v55, 0.0  ;;  %v802_v52 = vmax.f32 %v574_v59, 0.0  ;;  %v804_v55 = vmax.f32 %v735_v58, 0.0 }
 0x11f   : > { %v554_v58 = vadd.f32 %v1685_v23, %v351_v42  ;;  %v715_v59 = vadd.f32 %v1687_v24, %v351_v42  ;;  %v794_v63 = vmax.f32 %v562_v0, 0.0  ;;  %v796_v25 = vmax.f32 %v723_v49, 0.0 }
 0x120   : > { %833 = vmatprep.subr.mxu0 %v810_v61  ;;  %922 = vmatprep.subr.mxu1 %v812_v60  ;;  %v331_v60 = vpop.permute.xlu1 %330  ;;  %v798_v61 = vmax.f32 %v568_v44, 0.0  ;;  %v709_v26 = vadd.f32 %v1679_v20, %v346_v51  ;;  %v793_v27 = vmax.f32 %v560_v46, 0.0  ;;  %v795_v23 = vmax.f32 %v721_v47, 0.0  ;;  %v326_v42 = vpop.permute.xlu0 %325  ;;  %v1911_v44 = vld [vmem:[#allocation32_spill] sm:$0xff] }
 0x121   : > { %834 = vmatpush1.msra.mxu0 %v809_v2  ;;  %923 = vmatpush1.msra.mxu1 %v811_v45  ;;  %v800_v2 = vmax.f32 %v729_v1, 0.0  ;;  %v548_v1 = vadd.f32 %v1677_v19, %v346_v51  ;;  %v544_v24 = vadd.f32 %v1673_v17, %v1697_v56  ;;  %v705_v21 = vadd.f32 %v1675_v18, %v1697_v56  ;;  %v1915_v47 = vld [vmem:[#allocation28_spill] sm:$0xff] }
 0x122   : > { %835 = vmatprep.subr.mxu0 %v806_v4  ;;  %924 = vmatprep.subr.mxu1 %v808_v3  ;;  %v797_v3 = vmax.f32 %v566_v7, 0.0  ;;  %v799_v4 = vmax.f32 %v727_v43, 0.0  ;;  %v790_v22 = vmax.f32 %v556_v54, 0.0  ;;  %v792_v28 = vmax.f32 %v717_v57, 0.0  ;;  %v1916_v54 = vld [vmem:[#allocation25_spill] sm:$0xff] }
 0x123   : > { %836 = vmatpush1.msra.mxu0 %v805_v6  ;;  %925 = vmatpush1.msra.mxu1 %v807_v5  ;;  %v542_v19 = vadd.f32 %v1669_v15, %v1697_v56  ;;  %v703_v51 = vadd.f32 %v1671_v16, %v1697_v56  ;;  %v789_v20 = vmax.f32 %v554_v58, 0.0  ;;  %v791_v29 = vmax.f32 %v715_v59, 0.0  ;;  %v1913_v5 = vld [vmem:[#allocation30_spill] sm:$0xff] }
 0x124   : > { %837 = vmatprep.subr.mxu0 %v802_v52  ;;  %926 = vmatprep.subr.mxu1 %v804_v55  ;;  %v321_v30 = vpop.permute.xlu1 %320  ;;  %v538_v17 = vadd.f32 %v1665_v13, %v336_v48  ;;  %v699_v31 = vadd.f32 %v1667_v14, %v336_v48  ;;  %v786_v18 = vmax.f32 %v550_v8, 0.0  ;;  %v788_v32 = vmax.f32 %v711_v62, 0.0  ;;  %v1908_v14 = vld [vmem:[#allocation33_spill] sm:$0xff]  ;;  %v1914_v55 = vld [vmem:[#allocation27_spill] sm:$0xff]  ;;  %v1919_v8 = vld [vmem:[#allocation24_spill] sm:$0xff] }
 0x125   : > { %838 = vmatpush1.msra.mxu0 %v801_v50  ;;  %927 = vmatpush1.msra.mxu1 %v803_v53  ;;  %v536_v33 = vadd.f32 %v1661_v11, %v336_v48  ;;  %v697_v15 = vadd.f32 %v1663_v12, %v336_v48  ;;  %v785_v34 = vmax.f32 %v548_v1, 0.0  ;;  %v787_v35 = vmax.f32 %v709_v26, 0.0  ;;  %v316_v12 = vpop.permute.xlu0 %315  ;;  %v1920_v1 = vld [vmem:[#allocation21_spill] sm:$0xff] }
 0x126   : > { %839 = vmatprep.subr.mxu0 %v798_v61  ;;  %928 = vmatprep.subr.mxu1 %v800_v2  ;;  %v532_v56 = vadd.f32 %v1657_v9, %v331_v60  ;;  %v693_v16 = vadd.f32 %v1659_v10, %v331_v60  ;;  %v782_v36 = vmax.f32 %v544_v24, 0.0  ;;  %v784_v13 = vmax.f32 %v705_v21, 0.0  ;;  %v1912_v10 = vld [vmem:[#allocation29_spill] sm:$0xff]  ;;  %v1917_v61 = vld [vmem:[#allocation26_spill] sm:$0xff] }
 0x127   : > { %840 = vmatpush1.msra.mxu0 %v797_v3  ;;  %929 = vmatpush1.msra.mxu1 %v799_v4  ;;  %v530_v37 = vadd.f32 %v1908_v14, %v331_v60  ;;  %v691_v39 = vadd.f32 %v1909_v38, %v331_v60  ;;  %v781_v40 = vmax.f32 %v542_v19, 0.0  ;;  %v783_v11 = vmax.f32 %v703_v51, 0.0  ;;  %v1918_v3 = vld [vmem:[#allocation23_spill] sm:$0xff]  ;;  %v1923_v19 = vld [vmem:[#allocation20_spill] sm:$0xff]  ;;  %v1928_v14 = vld [vmem:[#allocation13_spill] sm:$0xff] }
 0x128   : > { %841 = vmatprep.subr.mxu0 %v794_v63  ;;  %930 = vmatprep.subr.mxu1 %v796_v25  ;;  %v526_v45 = vadd.f32 %v1910_v41, %v326_v42  ;;  %v687_v7 = vadd.f32 %v1911_v44, %v326_v42  ;;  %v778_v9 = vmax.f32 %v538_v17, 0.0  ;;  %v780_v43 = vmax.f32 %v699_v31, 0.0  ;;  %v311_v52 = vpop.permute.xlu1 %310  ;;  %v1925_v31 = vld [vmem:[#allocation18_spill] sm:$0xff] }
 0x129   : > { %842 = vmatpush1.msra.mxu0 %v793_v27  ;;  %931 = vmatpush1.msra.mxu1 %v795_v23  ;;  %v524_v6 = vadd.f32 %v1912_v10, %v326_v42  ;;  %v685_v48 = vadd.f32 %v1913_v5, %v326_v42  ;;  %v777_v0 = vmax.f32 %v536_v33, 0.0  ;;  %v779_v49 = vmax.f32 %v697_v15, 0.0  ;;  %v1921_v27 = vld [vmem:[#allocation22_spill] sm:$0xff]  ;;  %v306_v21 = vpop.permute.xlu0 %305 }
 0x12a   : > { %843 = vmatprep.subr.mxu0 %v790_v22  ;;  %932 = vmatprep.subr.mxu1 %v792_v28  ;;  %v520_v46 = vadd.f32 %v1914_v55, %v321_v30  ;;  %v681_v50 = vadd.f32 %v1915_v47, %v321_v30  ;;  %v774_v53 = vmax.f32 %v532_v56, 0.0  ;;  %v776_v60 = vmax.f32 %v693_v16, 0.0  ;;  %v1922_v22 = vld [vmem:[#allocation19_spill] sm:$0xff]  ;;  %v1927_v56 = vld [vmem:[#allocation16_spill] sm:$0xff]  ;;  %v1929_v38 = vld [vmem:[#allocation14_spill] sm:$0xff] }
 0x12b   : > { %844 = vmatpush1.msra.mxu0 %v789_v20  ;;  %933 = vmatpush1.msra.mxu1 %v791_v29  ;;  %v518_v57 = vadd.f32 %v1916_v54, %v321_v30  ;;  %v679_v2 = vadd.f32 %v1917_v61, %v321_v30  ;;  %v773_v58 = vmax.f32 %v530_v37, 0.0  ;;  %v775_v59 = vmax.f32 %v691_v39, 0.0  ;;  %v1924_v30 = vld [vmem:[#allocation17_spill] sm:$0xff]  ;;  %v287_v61 = vld [vmem:[%s1863_s3 + $0x8] sm:$0xff] }
 0x12c   : > { %845 = vmatprep.subr.mxu0 %v786_v18  ;;  %934 = vmatprep.subr.mxu1 %v788_v32  ;;  %v514_v4 = vadd.f32 %v1918_v3, %v316_v12  ;;  %v675_v62 = vadd.f32 %v1919_v8, %v316_v12  ;;  %v770_v63 = vmax.f32 %v526_v45, 0.0  ;;  %v772_v25 = vmax.f32 %v687_v7, 0.0  ;;  %v301_v15 = vpop.permute.xlu1 %300  ;;  %v1931_v45 = vld [vmem:[#allocation12_spill] sm:$0xff]  ;;  %v286_v54 = vld [vmem:[%s1863_s3] sm:$0xff] }
 0x12d   : > { %846 = vmatpush1.msra.mxu0 %v785_v34  ;;  %935 = vmatpush1.msra.mxu1 %v787_v35  ;;  %v512_v26 = vadd.f32 %v1920_v1, %v316_v12  ;;  %v673_v23 = vadd.f32 %v1921_v27, %v316_v12  ;;  %v769_v42 = vmax.f32 %v524_v6, 0.0  ;;  %v771_v24 = vmax.f32 %v685_v48, 0.0  ;;  %v1926_v34 = vld [vmem:[#allocation15_spill] sm:$0xff]  ;;  %v1933_v6 = vld [vmem:[#allocation10_spill] sm:$0xff] }
 0x12e   : > { %847 = vmatprep.subr.mxu0 %v782_v36  ;;  %936 = vmatprep.subr.mxu1 %v784_v13  ;;  %v508_v28 = vadd.f32 %v1922_v22, %v311_v52  ;;  %v669_v51 = vadd.f32 %v1923_v19, %v311_v52  ;;  %v766_v20 = vmax.f32 %v520_v46, 0.0  ;;  %v768_v29 = vmax.f32 %v681_v50, 0.0  ;;  %v1930_v12 = vld [vmem:[#allocation11_spill] sm:$0xff]  ;;  %v1937_v19 = vld [vmem:[#allocation5_spill] sm:$0xff] }
 0x12f   : > { %848 = vmatpush1.msra.mxu0 %v781_v40  ;;  %937 = vmatpush1.msra.mxu1 %v783_v11  ;;  %v506_v17 = vadd.f32 %v1924_v30, %v311_v52  ;;  %v667_v18 = vadd.f32 %v1925_v31, %v311_v52  ;;  %v765_v32 = vmax.f32 %v518_v57, 0.0  ;;  %v767_v33 = vmax.f32 %v679_v2, 0.0  ;;  %v288_v2 = vld [vmem:[%s1863_s3 + $0x10] sm:$0xff] }
 0x130   : > { %849 = vmatprep.subr.mxu0 %v778_v9  ;;  %938 = vmatprep.subr.mxu1 %v780_v43  ;;  %v502_v35 = vadd.f32 %v1926_v34, %v306_v21  ;;  %v663_v16 = vadd.f32 %v1927_v56, %v306_v21  ;;  %v762_v36 = vmax.f32 %v514_v4, 0.0  ;;  %v764_v13 = vmax.f32 %v675_v62, 0.0  ;;  %v1932_v43 = vld [vmem:[#allocation9_spill] sm:$0xff]  ;;  %v821_v1 = vpop.permute.xlu1 %820 }
 0x131   : > { %850 = vmatpush1.msra.mxu0 %v777_v0  ;;  %939 = vmatpush1.msra.mxu1 %v779_v49  ;;  %v500_v37 = vadd.f32 %v1928_v14, %v306_v21  ;;  %v661_v39 = vadd.f32 %v1929_v38, %v306_v21  ;;  %v761_v40 = vmax.f32 %v512_v26, 0.0  ;;  %v763_v11 = vmax.f32 %v673_v23, 0.0  ;;  %v1935_v26 = vld [vmem:[#allocation7_spill] sm:$0xff]  ;;  %v1936_v23 = vld [vmem:[#allocation8_spill] sm:$0xff] }
 0x132   : > { %851 = vmatprep.subr.mxu0 %v774_v53  ;;  %940 = vmatprep.subr.mxu1 %v776_v60  ;;  %v496_v41 = vadd.f32 %v1930_v12, %v301_v15  ;;  %v657_v44 = vadd.f32 %v1931_v45, %v301_v15  ;;  %v758_v7 = vmax.f32 %v508_v28, 0.0  ;;  %v760_v9 = vmax.f32 %v669_v51, 0.0 }
 0x133   : > { %852 = vmatpush1.msra.mxu0 %v773_v58  ;;  %941 = vmatpush1.msra.mxu1 %v775_v59  ;;  %v494_v10 = vadd.f32 %v1932_v43, %v301_v15  ;;  %v655_v5 = vadd.f32 %v1933_v6, %v301_v15  ;;  %v757_v48 = vmax.f32 %v506_v17, 0.0  ;;  %v759_v0 = vmax.f32 %v667_v18, 0.0  ;;  %v289_v58 = vld [vmem:[%s1863_s3 + $0x18] sm:$0xff]  ;;  %v816_v59 = vpop.permute.xlu0 %815 }
 0x134   : > { %853 = vmatprep.subr.mxu0 %v770_v63  ;;  %942 = vmatprep.subr.mxu1 %v772_v25  ;;  %v754_v49 = vmax.f32 %v502_v35, 0.0  ;;  %v756_v52 = vmax.f32 %v663_v16, 0.0  ;;  %v753_v55 = vmax.f32 %v500_v37, 0.0  ;;  %v755_v46 = vmax.f32 %v661_v39, 0.0 }
 0x135   : > { %854 = vmatpush1.msra.mxu0 %v769_v42  ;;  %943 = vmatpush1.msra.mxu1 %v771_v24  ;;  %v750_v47 = vmax.f32 %v496_v41, 0.0  ;;  %v752_v50 = vmax.f32 %v657_v44, 0.0  ;;  %v749_v53 = vmax.f32 %v494_v10, 0.0  ;;  %v751_v60 = vmax.f32 %v655_v5, 0.0 }
 0x136   : > { %855 = vmatprep.subr.mxu0 %v766_v20  ;;  %944 = vmatprep.subr.mxu1 %v768_v29  ;;  %v1934_v57 = vmov 0.0   ;;  %v1938_v20 = vld [vmem:[#allocation6_spill] sm:$0xff] }
 0x137   : > { %856 = vmatpush1.msra.mxu0 %v765_v32  ;;  %945 = vmatpush1.msra.mxu1 %v767_v33  ;;  %v826_v32 = vpop.permute.xlu0 %825 }
 0x138   : > { %857 = vmatprep.subr.mxu0 %v762_v36  ;;  %946 = vmatprep.subr.mxu1 %v764_v13 }
 0x139   : > { %858 = vmatpush1.msra.mxu0 %v761_v40  ;;  %947 = vmatpush1.msra.mxu1 %v763_v11  ;;  %v831_v40 = vpop.permute.xlu1 %830 }
 0x13a   : > { %859 = vmatprep.subr.mxu0 %v758_v7  ;;  %948 = vmatprep.subr.mxu1 %v760_v9 }
 0x13b   : > { %860 = vmatpush1.msra.mxu0 %v757_v48  ;;  %949 = vmatpush1.msra.mxu1 %v759_v0 }
 0x13c   : > { %861 = vmatprep.subr.mxu0 %v754_v49  ;;  %950 = vmatprep.subr.mxu1 %v756_v52 }
 0x13d   : > { %862 = vmatpush1.msra.mxu0 %v753_v55  ;;  %951 = vmatpush1.msra.mxu1 %v755_v46 }
 0x13e   : > { %863 = vmatprep.subr.mxu0 %v750_v47  ;;  %952 = vmatprep.subr.mxu1 %v752_v50 }
 0x13f   : > { %864 = vmatpush1.msra.mxu0 %v749_v53  ;;  %953 = vmatpush1.msra.mxu1 %v751_v60 }
 0x140   : > { %898 = vmatmul.mubr.f32.vlgmr.msra.gmra.mxu0 %v286_v54  ;;  %987 = vmatmul.mubr.f32.vlgmr.msra.gmra.mxu1 %v286_v54 }
 0x141   : > { %903 = vmatprep.mubr.f32.mxu0 %v1934_v57  ;;  %992 = vmatprep.mubr.f32.mxu1 %v1934_v57 }
 0x144   : > { %904 = vmatmul.mubr.f32.gmra.mxu0 %v287_v61  ;;  %993 = vmatmul.mubr.f32.gmra.mxu1 %v287_v61 }
 0x145   : > { %909 = vmatprep.mubr.f32.mxu0 %v1934_v57  ;;  %998 = vmatprep.mubr.f32.mxu1 %v1934_v57 }
 0x148   : > { %910 = vmatmul.mubr.f32.gmra.mxu0 %v288_v2  ;;  %999 = vmatmul.mubr.f32.gmra.mxu1 %v288_v2 }
 0x149   : > { %915 = vmatprep.mubr.f32.mxu0 %v1934_v57  ;;  %1004 = vmatprep.mubr.f32.mxu1 %v1934_v57 }
 0x14c   : > { %916 = vmatmul.mubr.f32.gmra.mxu0 %v289_v58  ;;  %1005 = vmatmul.mubr.f32.gmra.mxu1 %v289_v58 }
 0x200   : > { %v899_v3 = vpop.f32.mrf.mxu0  ;;  %v988_v4 = vpop.f32.mrf.mxu1 }
 0x201   : > { %v900_v8 = vadd.f32 %v899_v3, %v816_v59  ;;  %v989_v62 = vadd.f32 %v988_v4, %v816_v59 }
 0x202   : > { %v901_v63 = vpop.f32.mrf.mxu0  ;;  %v990_v25 = vpop.f32.mrf.mxu1 }
 0x203   : > { %v1011_v27 = vadd.f32 %v900_v8, %v1935_v26  ;;  %v1013_v42 = vadd.f32 %v989_v62, %v1936_v23  ;;  %v902_v24 = vadd.f32 %v901_v63, %v816_v59  ;;  %v991_v21 = vadd.f32 %v990_v25, %v816_v59 }
 0x204   : > { %v905_v22 = vpop.f32.mrf.mxu0  ;;  %v994_v28 = vpop.f32.mrf.mxu1 }
 0x205   : > { %1027 = vst [vmem:[%s1772_s25] sm:$0xff] %v1011_v27  ;;  %1029 = vst [vmem:[%s1772_s25 + $0x10] sm:$0xff] %v1013_v42  ;;  %v1012_v51 = vadd.f32 %v902_v24, %v1937_v19  ;;  %v1014_v29 = vadd.f32 %v991_v21, %v1938_v20  ;;  %v906_v30 = vadd.f32 %v905_v22, %v821_v1 }
 0x206   : > { %v995_v17 = vadd.f32 %v994_v28, %v821_v1  ;;  %v907_v31 = vpop.f32.mrf.mxu0  ;;  %v996_v18 = vpop.f32.mrf.mxu1 }
 0x207   : > { %1028 = vst [vmem:[%s1772_s25 + $0x8] sm:$0xff] %v1012_v51  ;;  %1030 = vst [vmem:[%s1772_s25 + $0x18] sm:$0xff] %v1014_v29  ;;  %v1015_v33 = vadd.f32 %v906_v30, %v1935_v26  ;;  %v908_v34 = vadd.f32 %v907_v31, %v821_v1  ;;  %v997_v35 = vadd.f32 %v996_v18, %v821_v1 }
 0x208   : > { %v1017_v15 = vadd.f32 %v995_v17, %v1936_v23  ;;  %v911_v56 = vpop.f32.mrf.mxu0  ;;  %v1000_v16 = vpop.f32.mrf.mxu1 }
 0x209   : > { %1031 = vst [vmem:[%s1772_s25 + $0x20] sm:$0xff] %v1015_v33  ;;  %v1016_v36 = vadd.f32 %v908_v34, %v1937_v19  ;;  %v1018_v13 = vadd.f32 %v997_v35, %v1938_v20  ;;  %v912_v14 = vadd.f32 %v911_v56, %v826_v32  ;;  %v1001_v37 = vadd.f32 %v1000_v16, %v826_v32 }
 0x20a   : > { %1033 = vst [vmem:[%s1772_s25 + $0x30] sm:$0xff] %v1017_v15  ;;  %v913_v38 = vpop.f32.mrf.mxu0  ;;  %v1002_v39 = vpop.f32.mrf.mxu1 }
 0x20b   : > { %1032 = vst [vmem:[%s1772_s25 + $0x28] sm:$0xff] %v1016_v36  ;;  %1034 = vst [vmem:[%s1772_s25 + $0x38] sm:$0xff] %v1018_v13  ;;  %v1019_v11 = vadd.f32 %v912_v14, %v1935_v26  ;;  %v1021_v12 = vadd.f32 %v1001_v37, %v1936_v23  ;;  %v914_v41 = vadd.f32 %v913_v38, %v826_v32 }
 0x20c   : > { %v1003_v45 = vadd.f32 %v1002_v39, %v826_v32  ;;  %v917_v44 = vpop.f32.mrf.mxu0  ;;  %v1006_v7 = vpop.f32.mrf.mxu1 }
 0x20d   : > { %1035 = vst [vmem:[%s1772_s25 + $0x40] sm:$0xff] %v1019_v11  ;;  %1037 = vst [vmem:[%s1772_s25 + $0x50] sm:$0xff] %v1021_v12  ;;  %v1020_v9 = vadd.f32 %v914_v41, %v1937_v19  ;;  %v918_v10 = vadd.f32 %v917_v44, %v831_v40  ;;  %v1007_v6 = vadd.f32 %v1006_v7, %v831_v40 }
 0x20e   : > { %v1022_v43 = vadd.f32 %v1003_v45, %v1938_v20  ;;  %v919_v5 = vpop.f32.mrf.mxu0  ;;  %v1008_v48 = vpop.f32.mrf.mxu1 }
 0x20f   : > { %1036 = vst [vmem:[%s1772_s25 + $0x48] sm:$0xff] %v1020_v9  ;;  %v1023_v0 = vadd.f32 %v918_v10, %v1935_v26  ;;  %v1025_v49 = vadd.f32 %v1007_v6, %v1936_v23  ;;  %v920_v52 = vadd.f32 %v919_v5, %v831_v40  ;;  %v1009_v55 = vadd.f32 %v1008_v48, %v831_v40 }
 0x210   : > { %1038 = vst [vmem:[%s1772_s25 + $0x58] sm:$0xff] %v1022_v43 }
 0x211   : > { %1039 = vst [vmem:[%s1772_s25 + $0x60] sm:$0xff] %v1023_v0  ;;  %1041 = vst [vmem:[%s1772_s25 + $0x70] sm:$0xff] %v1025_v49  ;;  %v1024_v46 = vadd.f32 %v920_v52, %v1937_v19  ;;  %v1026_v47 = vadd.f32 %v1009_v55, %v1938_v20 }
 0x213   : > { %1040 = vst [vmem:[%s1772_s25 + $0x68] sm:$0xff] %v1024_v46  ;;  %1042 = vst [vmem:[%s1772_s25 + $0x78] sm:$0xff] %v1026_v47 }
 0x214   : > { %1259 = shalt.err (!%p1256_p5)
}
 0x215   : > { %s1260_s14 = scalar_lea.hbm %s1803_s9, 2048  ;;  %s1264_s17 = scalar_lea.hbm %s1865_s5, 4096 }
 0x216   : > { %p1261_p6 = scmp.ne.s32.totalorder %s1803_s9, %s1260_s14  ;;  %p1265_p10 = scmp.lt.s32.totalorder %s1803_s9, %s1865_s5 }
 0x217   : > { %p1266_p11 = scmp.lt.s32.totalorder %s1264_s17, %s1260_s14 }
 0x218   : > { %p1262_p7 = pnand %p1261_p6, %p1399_p4 }
 0x219   : > { %p1267_p12 = por %p1266_p11, %p1265_p10 }
 0x21a   : > { %p1263_p9 = pneg %p1262_p7 }
 0x21c   : > { %p1268_p13 = pnand %p1267_p12, %p1263_p9 }
 0x21e   : > { %1271 = shalt.err (!%p1268_p13)
}
 0x21f   : > { %s1327_s27 = smov 512   ;;  %s1328_s7 = smov 32  }
 0x220   : > { %1185 = dma.vmem_to_hbm [thread:$0]  (%p1399_p4), %s1805_s29, 2048, %s1803_s9, %s1815_s21, %s1327_s27, %s1327_s27, %s1328_s7  }
 0x221 PF: > { %p1191_p0 = scmp.ge.s32.totalorder %s1322_s23, 2  ;;  %s1074_s8 = sand.u32 1, %s1302_s18  }
 0x222   : > { %s1075_s10 = scalar_lea.sflag [#allocation3], %s1074_s8 }
 0x223   : > { %p1188_p1 = pnand %p1191_p0, %p1406_p8 }
 0x225   : > { %p1189_p2 = pneg %p1188_p1 }
 0x227   : > { %1297 = dma.done.wait (%p1189_p2), %s1075_s10, 2048  }
 0x228   : > { %1299 = vsyncadd (%p1189_p2), %s1075_s10, 4294965248  ;;  %s18_s23 = sadd.s32 1, %s1322_s23   ;;  %s1939_s18 = smov %s1306_s19 }
 0x229   : > { %p15_p3 = scmp.ge.s32.totalorder %s18_s23, 4   ;;  %s1940_s19 = smov %s1310_s20 }
 0x22a   : > { %s1941_s20 = smov %s1412_s6  ;;  %s1942_s21 = smov %s1318_s22 }
 0x22b   : > { %s1943_s22 = smov %s1945_s26  ;;  %17 = sbr.rel (!%p15_p3) target bundleno = 4 (0x4), region = 75 }
 0x230   :  { %1080 = vsyncpa [#allocation3], 1 }
 0x231   :  { %1082 = vsyncpa [#allocation3 + $0x1], 1 }

</bundles_post_ra>
